<compile_context>
chip_gen: v7x
topology: tpu7x:2x2x1
jax: 0.10.0
libtpu: 0.0.40
codegen_flags: <defaults>
</compile_context>

<pallas_src>
import functools

import jax
import jax.numpy as jnp
from jax.experimental import pallas as pl
from jax.experimental.pallas import tpu as pltpu

_LANES = 128
_SUBLANES = 8
_CHUNK = _SUBLANES * _LANES  # 1024 elements: one (8,128) f32 vreg


def _bce_logits_terms(x, t, inv_input_scale, inv_target_scale):
    """Per-element stable BCE-with-logits(z, sigmoid(a)) in f32."""
    z = x.astype(jnp.float32) * inv_input_scale
    a = t.astype(jnp.float32) * inv_target_scale
    # sigmoid(a) == 0.5 * tanh(a / 2) + 0.5  (exact identity; a single EUP op
    # instead of exp + full-precision divide).
    y = 0.5 * jnp.tanh(0.5 * a) + 0.5
    # Matches torch.nn.BCEWithLogitsLoss: max(z,0) - z*y + log1p(exp(-|z|)).
    return jnp.maximum(z, 0.0) - z * y + jnp.log1p(jnp.exp(-jnp.abs(z)))


def _wdl_kernel(x_ref, t_ref, o_ref, acc_ref, *,
                inv_input_scale, inv_target_scale, inv_n_total,
                tile_rows, steps_per_shard, valid_rows, first_masked_block,
                needs_mask):
    s = pl.program_id(0)      # shard (parallel across TensorCores)
    step = pl.program_id(1)   # streaming / reduction step within the shard

    @pl.when(step == 0)
    def _():
        acc_ref[...] = jnp.zeros_like(acc_ref)

    loss = _bce_logits_terms(x_ref[...], t_ref[...],
                             inv_input_scale, inv_target_scale)

    def accumulate(v):
        # (tile_rows, 128) -> (8, 128): groups of 8 sublane-rows summed with
        # pure VPU adds; the last two dims already match the native (8,128)
        # tile, so the reshape should be a layout no-op.
        # TODO(synk): confirm via pl.lower_as_mlir that no VMEM copy is
        # emitted; if one appears, replace with an unrolled strided add over
        # v[pl.ds(k * 8, 8), :].
        acc_ref[...] += v.reshape(
            tile_rows // _SUBLANES, _SUBLANES, _LANES).sum(axis=0)

    if needs_mask:
        raw_block = s * steps_per_shard + step
        in_interior = raw_block < first_masked_block

        @pl.when(in_interior)
        def _():
            # Hot path: fully-valid interior tile, no iota/compare/select.
            accumulate(loss)

        @pl.when(jnp.logical_not(in_interior))
        def _():
            # Boundary block (partial rows) or clamped duplicate blocks from
            # grid overshoot: mask by global row index.  Garbage rows may flow
            # through tanh/exp/log above, but the element-wise select never
            # propagates NaN/Inf from the unselected branch.
            row = raw_block * tile_rows + jax.lax.broadcasted_iota(
                jnp.int32, (tile_rows, _LANES), 0)
            accumulate(jnp.where(row < valid_rows, loss, 0.0))
    else:
        accumulate(loss)

    @pl.when(step == steps_per_shard - 1)
    def _():
        o_ref[...] = (acc_ref[...] * inv_n_total)[None]


def _default_num_shards():
    """2 on multi-TensorCore chips (v7x / megacore v4 / v5p), else 1."""
    try:
        kind = jax.devices()[0].device_kind.lower()
    except Exception:
        return 1
    if any(tag in kind for tag in ("v7", "7x", "v4", "v5p")):
        return 2
    return 1


def wdl_loss(x, t, input_scale: float = 410.0, target_scale: float = 410.0,
             tile_rows: int = 8192, num_shards=None):
    """Mean BCE-with-logits between x/input_scale and sigmoid(t/target_scale)."""
    assert x.shape == t.shape, (x.shape, t.shape)
    n = x.size
    assert n > 0
    inv_in = 1.0 / float(input_scale)
    inv_tg = 1.0 / float(target_scale)

    xf = x.reshape(-1)
    tf = t.reshape(-1)

    aligned = (n // _CHUNK) * _CHUNK
    tail = n - aligned

    if aligned == 0:
        # Whole input is smaller than one (8,128) vreg: nothing for the kernel.
        return jnp.sum(_bce_logits_terms(xf, tf, inv_in, inv_tg)) / n

    # Aligned prefix for the kernel.  When n is already 1024-aligned this is a
    # pure bitcast reshape (zero-copy); otherwise only the prefix is touched
    # (no pad-region writes, no in-kernel lane masking needed).
    if tail:
        x2 = xf[:aligned].reshape(-1, _LANES)
        t2 = tf[:aligned].reshape(-1, _LANES)
    else:
        x2 = xf.reshape(-1, _LANES)
        t2 = tf.reshape(-1, _LANES)
    rows = aligned // _LANES                      # always a multiple of 8

    # Tile sizing: multiple of 8 rows, clamped to the array.
    tile_rows = max(_SUBLANES, (int(tile_rows) // _SUBLANES) * _SUBLANES)
    tile_rows = min(tile_rows, rows)
    blocks = pl.cdiv(rows, tile_rows)

    if num_shards is None:
        num_shards = _default_num_shards()
    num_shards = max(1, min(int(num_shards), blocks))
    steps = pl.cdiv(blocks, num_shards)
    last_block = blocks - 1

    partial_boundary = (rows % tile_rows) != 0
    has_duplicates = num_shards * steps > blocks
    needs_mask = partial_boundary or has_duplicates
    first_masked_block = blocks - 1 if partial_boundary else blocks

    def in_map(s, i):
        # Clamp so the DMA stays in-bounds; clamped duplicate blocks are fully
        # masked out in-kernel via the global row index.
        return (jnp.minimum(s * steps + i, last_block), 0)

    kernel = functools.partial(
        _wdl_kernel,
        inv_input_scale=inv_in,
        inv_target_scale=inv_tg,
        inv_n_total=1.0 / float(n),
        tile_rows=tile_rows,
        steps_per_shard=steps,
        valid_rows=rows,
        first_masked_block=first_masked_block,
        needs_mask=needs_mask,
    )

    itemsize = jnp.dtype(x.dtype).itemsize
    cost = pl.CostEstimate(
        flops=10 * aligned,
        transcendentals=3 * aligned,
        bytes_accessed=2 * aligned * itemsize + num_shards * _CHUNK * 4,
    )

    partials = pl.pallas_call(
        kernel,
        out_shape=jax.ShapeDtypeStruct((num_shards, _SUBLANES, _LANES),
                                       jnp.float32),
        grid_spec=pltpu.PrefetchScalarGridSpec(
            num_scalar_prefetch=0,
            grid=(num_shards, steps),
            in_specs=[
                pl.BlockSpec((tile_rows, _LANES), in_map),
                pl.BlockSpec((tile_rows, _LANES), in_map),
            ],
            out_specs=pl.BlockSpec((1, _SUBLANES, _LANES), lambda s, i: (s, 0, 0)),
            scratch_shapes=[pltpu.VMEM((_SUBLANES, _LANES), jnp.float32)],
        ),
        compiler_params=pltpu.CompilerParams(
            dimension_semantics=("parallel", "arbitrary"),
            vmem_limit_bytes=48 << 20,
        ),
        cost_estimate=cost,
    )(x2, t2)

    # Single tiny cross-lane reduce of the per-shard partials.
    total = jnp.sum(partials)
    if tail:
        # <1024-element tail folded in with a trivial plain-jnp reduction.
        total = total + jnp.sum(
            _bce_logits_terms(xf[aligned:], tf[aligned:], inv_in, inv_tg)) / n
    return total


def _wdl_loss_ref(x, t, input_scale=410.0, target_scale=410.0):
    z = x.astype(jnp.float32) / input_scale
    y = jax.nn.sigmoid(t.astype(jnp.float32) / target_scale)
    loss = jnp.maximum(z, 0.0) - z * y + jnp.log1p(jnp.exp(-jnp.abs(z)))
    return jnp.mean(loss)


if __name__ == "__main__":
    key = jax.random.PRNGKey(0)
    k1, k2, k3, k4 = jax.random.split(key, 4)

    # Case 1: lane-aligned f32 (centipawn-scale evals). 4096 elements → pure
    # unmasked kernel path, zero-copy bitcast reshape.
    x = jax.random.normal(k1, (32, 128), dtype=jnp.float32) * 300.0
    t = jax.random.normal(k2, (32, 128), dtype=jnp.float32) * 300.0
    out = jax.block_until_ready(wdl_loss(x, t))
    ref = _wdl_loss_ref(x, t)
    assert jnp.allclose(out, ref, rtol=1e-5, atol=1e-5), (out, ref)

    # Case 2: ragged shape → aligned-prefix kernel + tiny plain-jnp tail
    # (no full-array pad copy).
    xr = jax.random.normal(k3, (33, 100), dtype=jnp.float32) * 300.0
    tr = jax.random.normal(k4, (33, 100), dtype=jnp.float32) * 300.0
    out_r = jax.block_until_ready(wdl_loss(xr, tr))
    ref_r = _wdl_loss_ref(xr, tr)
    assert jnp.allclose(out_r, ref_r, rtol=1e-5, atol=1e-5), (out_r, ref_r)

    # Case 3: bf16 inputs (halves HBM traffic; upcast happens in-kernel).
    xb = x.astype(jnp.bfloat16)
    tb = t.astype(jnp.bfloat16)
    out_b = jax.block_until_ready(wdl_loss(xb, tb))
    ref_b = _wdl_loss_ref(xb, tb)
    assert jnp.allclose(out_b, ref_b, rtol=1e-4, atol=1e-4), (out_b, ref_b)

    # Case 4: tiny input below one 1024-element chunk → wrapper-only jnp path.
    xs = jax.random.normal(k1, (7, 10), dtype=jnp.float32) * 300.0
    ts = jax.random.normal(k2, (7, 10), dtype=jnp.float32) * 300.0
    out_s = jax.block_until_ready(wdl_loss(xs, ts))
    ref_s = _wdl_loss_ref(xs, ts)
    assert jnp.allclose(out_s, ref_s, rtol=1e-5, atol=1e-5), (out_s, ref_s)

    print("KERNEL_OK")
</pallas_src>

<mosaic_0001>
module attributes {stable_mosaic.version = 11 : i64} {
  func.func @_wdl_kernel(%arg0: i32, %arg1: i32, %arg2: memref<32x128xf32, #tpu.memory_space<vmem>>, %arg3: memref<32x128xf32, #tpu.memory_space<vmem>>, %arg4: memref<1x8x128xf32, #tpu.memory_space<vmem>>, %arg5: memref<8x128xf32, #tpu.memory_space<vmem>>) attributes {dimension_semantics = [#tpu.dimension_semantics<parallel>, #tpu.dimension_semantics<arbitrary>], iteration_bounds = array<i64: 1, 1>, scalar_prefetch = 0 : i64, scratch_operands = 1 : i64, tpu.core_type = #tpu.core_type<tc>, window_params = [{transform_indices = @transform_0, window_bounds = array<i64: 32, 128>}, {transform_indices = @transform_1, window_bounds = array<i64: 32, 128>}, {transform_indices = @transform_2, window_bounds = array<i64: 1, 8, 128>}]} {
    %c0_i32 = arith.constant 0 : i32
    %0 = arith.cmpi eq, %arg1, %c0_i32 : i32
    %1 = arith.extui %0 : i1 to i32
    %c0_i32_0 = arith.constant 0 : i32
    %2 = arith.cmpi ne, %1, %c0_i32_0 : i32
    scf.if %2 {
      %cst_17 = arith.constant 0.000000e+00 : f32
      %34 = vector.broadcast %cst_17 : f32 to vector<8x128xf32>
      %c0_18 = arith.constant 0 : index
      %c0_19 = arith.constant 0 : index
      %35 = vector.load %arg5[%c0_18, %c0_19] : memref<8x128xf32, #tpu.memory_space<vmem>>, vector<8x128xf32>
      tpu.vector_store %arg5[%c0_18, %c0_19], %34 {strides = array<i32>} : memref<8x128xf32, #tpu.memory_space<vmem>>, vector<8x128xf32>,
    } else {
    }
    %c0 = arith.constant 0 : index
    %c0_1 = arith.constant 0 : index
    %3 = vector.load %arg2[%c0, %c0_1] : memref<32x128xf32, #tpu.memory_space<vmem>>, vector<32x128xf32>
    %c0_2 = arith.constant 0 : index
    %c0_3 = arith.constant 0 : index
    %4 = vector.load %arg3[%c0_2, %c0_3] : memref<32x128xf32, #tpu.memory_space<vmem>>, vector<32x128xf32>
    %cst = arith.constant 0.00243902439 : f32
    %5 = vector.broadcast %cst : f32 to vector<32x128xf32>
    %6 = arith.mulf %3, %5 : vector<32x128xf32>
    %cst_4 = arith.constant 0.00243902439 : f32
    %7 = vector.broadcast %cst_4 : f32 to vector<32x128xf32>
    %8 = arith.mulf %4, %7 : vector<32x128xf32>
    %cst_5 = arith.constant 5.000000e-01 : f32
    %9 = vector.broadcast %cst_5 : f32 to vector<32x128xf32>
    %10 = arith.mulf %9, %8 : vector<32x128xf32>
    %11 = math.tanh %10 : vector<32x128xf32>
    %cst_6 = arith.constant 5.000000e-01 : f32
    %12 = vector.broadcast %cst_6 : f32 to vector<32x128xf32>
    %13 = arith.mulf %12, %11 : vector<32x128xf32>
    %cst_7 = arith.constant 5.000000e-01 : f32
    %14 = vector.broadcast %cst_7 : f32 to vector<32x128xf32>
    %15 = arith.addf %13, %14 : vector<32x128xf32>
    %cst_8 = arith.constant 0.000000e+00 : f32
    %16 = vector.broadcast %cst_8 : f32 to vector<32x128xf32>
    %17 = arith.maximumf %6, %16 : vector<32x128xf32>
    %18 = arith.mulf %6, %15 : vector<32x128xf32>
    %19 = arith.subf %17, %18 : vector<32x128xf32>
    %20 = math.absf %6 : vector<32x128xf32>
    %cst_9 = arith.constant 0.000000e+00 : f32
    %21 = vector.broadcast %cst_9 : f32 to vector<32x128xf32>
    %22 = arith.subf %21, %20 : vector<32x128xf32>
    %23 = math.exp %22 : vector<32x128xf32>
    %24 = math.log1p %23 : vector<32x128xf32>
    %25 = arith.addf %19, %24 : vector<32x128xf32>
    %c0_10 = arith.constant 0 : index
    %c0_11 = arith.constant 0 : index
    %26 = vector.load %arg5[%c0_10, %c0_11] : memref<8x128xf32, #tpu.memory_space<vmem>>, vector<8x128xf32>
    %27 = vector.shape_cast %25 : vector<32x128xf32> to vector<4x8x128xf32>
    %cst_12 = arith.constant dense<0.000000e+00> : vector<8x128xf32>
    %28 = vector.multi_reduction <add>, %27, %cst_12 [0] : vector<4x8x128xf32> to vector<8x128xf32>
    %29 = arith.addf %26, %28 : vector<8x128xf32>
    %c0_13 = arith.constant 0 : index
    %c0_14 = arith.constant 0 : index
    %30 = vector.load %arg5[%c0_13, %c0_14] : memref<8x128xf32, #tpu.memory_space<vmem>>, vector<8x128xf32>
    tpu.vector_store %arg5[%c0_13, %c0_14], %29 {strides = array<i32>} : memref<8x128xf32, #tpu.memory_space<vmem>>, vector<8x128xf32>,
    %c0_i32_15 = arith.constant 0 : i32
    %31 = arith.cmpi eq, %arg1, %c0_i32_15 : i32
    %32 = arith.extui %31 : i1 to i32
    %c0_i32_16 = arith.constant 0 : i32
    %33 = arith.cmpi ne, %32, %c0_i32_16 : i32
    scf.if %33 {
      %c0_17 = arith.constant 0 : index
      %c0_18 = arith.constant 0 : index
      %34 = vector.load %arg5[%c0_17, %c0_18] : memref<8x128xf32, #tpu.memory_space<vmem>>, vector<8x128xf32>
      %cst_19 = arith.constant 2.44140625E-4 : f32
      %35 = vector.broadcast %cst_19 : f32 to vector<8x128xf32>
      %36 = arith.mulf %34, %35 : vector<8x128xf32>
      %37 = vector.shape_cast %36 : vector<8x128xf32> to vector<1x8x128xf32>
      %c0_20 = arith.constant 0 : index
      %c0_21 = arith.constant 0 : index
      %c0_22 = arith.constant 0 : index
      %38 = vector.load %arg4[%c0_20, %c0_21, %c0_22] : memref<1x8x128xf32, #tpu.memory_space<vmem>>, vector<1x8x128xf32>
      tpu.vector_store %arg4[%c0_20, %c0_21, %c0_22], %37 {strides = array<i32>} : memref<1x8x128xf32, #tpu.memory_space<vmem>>, vector<1x8x128xf32>,
    } else {
    }
    return
  }
  func.func @transform_0(%arg0: i32, %arg1: i32) -> (i32, i32) {
    %c1_i32 = arith.constant 1 : i32
    %0 = arith.muli %arg0, %c1_i32 : i32
    %1 = arith.addi %0, %arg1 : i32
    %c0_i32 = arith.constant 0 : i32
    %2 = arith.minsi %1, %c0_i32 : i32
    %c0_i32_0 = arith.constant 0 : i32
    %c0_i32_1 = arith.constant 0 : i32
    return %2, %c0_i32_0 : i32, i32
  }
  func.func @transform_1(%arg0: i32, %arg1: i32) -> (i32, i32) {
    %c1_i32 = arith.constant 1 : i32
    %0 = arith.muli %arg0, %c1_i32 : i32
    %1 = arith.addi %0, %arg1 : i32
    %c0_i32 = arith.constant 0 : i32
    %2 = arith.minsi %1, %c0_i32 : i32
    %c0_i32_0 = arith.constant 0 : i32
    %c0_i32_1 = arith.constant 0 : i32
    return %2, %c0_i32_0 : i32, i32
  }
  func.func @transform_2(%arg0: i32, %arg1: i32) -> (i32, i32, i32) {
    %c0_i32 = arith.constant 0 : i32
    %c0_i32_0 = arith.constant 0 : i32
    %c0_i32_1 = arith.constant 0 : i32
    return %arg0, %c0_i32, %c0_i32_0 : i32, i32, i32
  }
}

</mosaic_0001>

<bundles_post_ra>
// kernel: tpu_custom_call.1
= control target key start
LH: loop header
LB: loop body
LE: loop exit
PB: predicated region body
PF: predicated region fallthrough
CT: control target
= control target key end

     0   :  { %7 = vsyncpa [#allocation4], 0  ;;  %s380_s0 = inlined_call_operand.hbm [shape: f32[32,128], index: 0, kind: input, shape index: {}]   ;;  %s381_s1 = inlined_call_operand.hbm [shape: f32[32,128], index: 1, kind: input, shape index: {}]   ;;  %s382_s2 = inlined_call_operand.hbm [shape: f32[1,8,128], index: 2, kind: output, shape index: {}]  }
   0x1   :  { %8 = vsyncpa [#allocation7], 0 }
   0x2   :  { %9 = vsyncpa [#allocation5], 0  ;;  %s298_s9 = smov [#allocation3]   ;;  %s226_s13 = scalar_lea.hbm %s380_s0, 512 }
   0x3   :  { %s21_s10 = sshll.u32 %s298_s9, 4  ;;  %p227_p0 = scmp.ne.s32.totalorder %s380_s0, %s226_s13  ;;  %s22_s10 = int_to_ptr.vmem [resolvable:$true] %s21_s10 }
   0x4   :  { %p230_p1 = scmp.lt.u32.totalorder %s226_s13, %s380_s0 }
   0x6   :  { %p232_p2 = pnand %p230_p1, %p227_p0 }
   0x8   :  { %235 = shalt.err (!%p232_p2)
}
   0x9   :  { %s236_s18 = scalar_lea.vmem %s22_s10, 512  ;;  %p241_p4 = scmp.lt.s32.totalorder %s22_s10, %s22_s10 }
   0xa   :  { %p237_p3 = scmp.ne.s32.totalorder %s22_s10, %s236_s18  ;;  %p242_p5 = scmp.lt.s32.totalorder %s236_s18, %s236_s18 }
   0xc   :  { %p243_p6 = por %p242_p5, %p241_p4 }
   0xe   :  { %p244_p7 = pnand %p243_p6, %p237_p3 }
  0x10   :  { %247 = shalt.err (!%p244_p7)
}
  0x11   :  { %s299_s19 = smov 128   ;;  %s300_s20 = smov 8  }
  0x12   :  { %27 = dma.hbm_to_vmem [thread:$0]  %s380_s0, 512, %s22_s10, [#allocation4], %s299_s19, %s299_s19, %s300_s20  }
  0x13   :  { %s301_s23 = smov [#allocation6]   ;;  %s248_s27 = scalar_lea.hbm %s381_s1, 512 }
  0x14   :  { %s39_s24 = sshll.u32 %s301_s23, 4  ;;  %p249_p8 = scmp.ne.s32.totalorder %s381_s1, %s248_s27  ;;  %s40_s24 = int_to_ptr.vmem [resolvable:$true] %s39_s24 }
  0x15   :  { %p252_p9 = scmp.lt.u32.totalorder %s248_s27, %s381_s1 }
  0x17   :  { %p254_p10 = pnand %p252_p9, %p249_p8 }
  0x19   :  { %257 = shalt.err (!%p254_p10)
}
  0x1a   :  { %s258_s4 = scalar_lea.vmem %s40_s24, 512  ;;  %p263_p12 = scmp.lt.s32.totalorder %s40_s24, %s40_s24 }
  0x1b   :  { %p259_p11 = scmp.ne.s32.totalorder %s40_s24, %s258_s4  ;;  %p264_p13 = scmp.lt.s32.totalorder %s258_s4, %s258_s4 }
  0x1d   :  { %p265_p0 = por %p264_p13, %p263_p12 }
  0x1f   :  { %p266_p1 = pnand %p265_p0, %p259_p11 }
  0x21   :  { %269 = shalt.err (!%p266_p1)
}
  0x22   :  { %45 = dma.hbm_to_vmem [thread:$0]  %s381_s1, 512, %s40_s24, [#allocation7], %s299_s19, %s299_s19, %s300_s20  }
  0x23   :  { %292 = dma.done.wait [#allocation4], 512  }
  0x24   :  { %293 = vsyncadd [#allocation4], 4294966784 }
  0x25   :  { %294 = dma.done.wait [#allocation7], 512  }
  0x26   :  { %295 = vsyncadd [#allocation7], 4294966784  ;;  %v65_v0 = vld [vmem:[#allocation3] sm:$0xff]  ;;  %v66_v1 = vld [vmem:[#allocation3 + $0x8] sm:$0xff]  ;;  %s302_s1 = smov [#allocation8]  }
  0x27   :  { %v67_v2 = vld [vmem:[#allocation3 + $0x10] sm:$0xff]  ;;  %v68_v3 = vld [vmem:[#allocation3 + $0x18] sm:$0xff]  ;;  %v69_v4 = vld [vmem:[#allocation6] sm:$0xff]  ;;  %v342_v6 = vmul.f32 0.0024390244, %v65_v0  ;;  %s183_s6 = sshll.u32 %s302_s1, 4  ;;  %s184_s6 = int_to_ptr.vmem [resolvable:$true] %s183_s6 }
  0x28   :  { %v70_v5 = vld [vmem:[#allocation6 + $0x8] sm:$0xff]  ;;  %v71_v7 = vld [vmem:[#allocation6 + $0x10] sm:$0xff]  ;;  %v72_v8 = vld [vmem:[#allocation6 + $0x18] sm:$0xff]  ;;  %v344_v9 = vmul.f32 0.0024390244, %v66_v1  ;;  %s270_s7 = scalar_lea.vmem %s184_s6, 128  ;;  %p275_p3 = scmp.lt.s32.totalorder %s184_s6, %s184_s6 }
  0x29   :  { %v346_v10 = vmul.f32 0.0024390244, %v67_v2  ;;  %v348_v11 = vmul.f32 0.0024390244, %v68_v3  ;;  %v77_v12 = vmul.f32 0.0024390244, %v69_v4  ;;  %p271_p2 = scmp.ne.s32.totalorder %s184_s6, %s270_s7  ;;  %p276_p4 = scmp.lt.s32.totalorder %s270_s7, %s270_s7 }
  0x2a   :  { %v78_v13 = vmul.f32 0.0024390244, %v70_v5  ;;  %v79_v14 = vmul.f32 0.0024390244, %v71_v7  ;;  %v80_v15 = vmul.f32 0.0024390244, %v72_v8 }
  0x2b   :  { %v81_v16 = vmul.f32 0.5, %v77_v12  ;;  %v109_v19 = vand.u32 2147483647, %v342_v6  ;;  %v110_v20 = vand.u32 2147483647, %v344_v9  ;;  %v97_v53 = vmax.f32 %v342_v6, 0.0  ;;  %p277_p5 = por %p276_p4, %p275_p3 }
  0x2c   :  { %v82_v17 = vmul.f32 0.5, %v78_v13  ;;  %v83_v18 = vmul.f32 0.5, %v79_v14  ;;  %v84_v21 = vmul.f32 0.5, %v80_v15  ;;  %v111_v22 = vand.u32 2147483647, %v346_v10 }
  0x2d   :  { %v112_v23 = vand.u32 2147483647, %v348_v11  ;;  %202 = vtanh.f32 %v81_v16  ;;  %v113_v24 = vsub.f32 0.0, %v109_v19  ;;  %v114_v25 = vsub.f32 0.0, %v110_v20  ;;  %p278_p6 = pnand %p277_p5, %p271_p2 }
  0x2e   :  { %204 = vtanh.f32 %v82_v17  ;;  %v115_v26 = vsub.f32 0.0, %v111_v22  ;;  %v98_v61 = vmax.f32 %v344_v9, 0.0  ;;  %v99_v0 = vmax.f32 %v346_v10, 0.0 }
  0x2f   :  { %v116_v27 = vsub.f32 0.0, %v112_v23  ;;  %206 = vtanh.f32 %v83_v18  ;;  %v117_v28 = vmul.f32 1.442695, %v113_v24  ;;  %v119_v29 = vmul.f32 1.442695, %v114_v25 }
  0x30   :  { %208 = vtanh.f32 %v84_v21  ;;  %v121_v30 = vmul.f32 1.442695, %v115_v26  ;;  %v100_v1 = vmax.f32 %v348_v11, 0.0 }
  0x31   :  { %v123_v31 = vmul.f32 1.442695, %v116_v27  ;;  %210 = vpow2.f32 %v117_v28 }
  0x32   :  { %212 = vpow2.f32 %v119_v29 }
  0x33   :  { %214 = vpow2.f32 %v121_v30 }
  0x34   :  { %216 = vpow2.f32 %v123_v31 }
  0x37   :  { %v203_v32 = vpop.eup %202 }
  0x38   :  { %v205_v33 = vpop.eup %204  ;;  %v89_v36 = vmul.f32 0.5, %v203_v32 }
  0x39   :  { %v207_v34 = vpop.eup %206  ;;  %v90_v41 = vmul.f32 0.5, %v205_v33 }
  0x3a   :  { %v209_v35 = vpop.eup %208  ;;  %v91_v44 = vmul.f32 0.5, %v207_v34  ;;  %v93_v45 = vadd.f32 0.5, %v89_v36 }
  0x3b   :  { %v211_v37 = vpop.eup %210  ;;  %v92_v46 = vmul.f32 0.5, %v209_v35  ;;  %v94_v50 = vadd.f32 0.5, %v90_v41 }
  0x3c   :  { %v213_v38 = vpop.eup %212  ;;  %v125_v39 = vadd.f32 1.0, %v211_v37  ;;  %v128_v47 = vmul.f32 -0.5, %v211_v37  ;;  %v95_v52 = vadd.f32 0.5, %v91_v44  ;;  %v101_v54 = vmul.f32 %v93_v45, %v342_v6 }
  0x3d   :  { %v215_v40 = vpop.eup %214  ;;  %v134_v42 = vadd.f32 1.0, %v213_v38  ;;  %v137_v48 = vmul.f32 -0.5, %v213_v38  ;;  %v96_v55 = vadd.f32 0.5, %v92_v46  ;;  %v131_v58 = vand.u32 2147483647, %v211_v37 }
  0x3e   :  { %v217_v43 = vpop.eup %216  ;;  %218 = vlog2.f32 %v125_v39  ;;  %v143_v49 = vadd.f32 1.0, %v215_v40  ;;  %v129_v56 = vadd.f32 1.0, %v128_v47  ;;  %v146_v57 = vmul.f32 -0.5, %v215_v40 }
  0x3f   :  { %220 = vlog2.f32 %v134_v42  ;;  %v152_v51 = vadd.f32 1.0, %v217_v43  ;;  %v138_v59 = vadd.f32 1.0, %v137_v48  ;;  %v155_v60 = vmul.f32 -0.5, %v217_v43 }
  0x40   :  { %222 = vlog2.f32 %v143_v49  ;;  %v102_v62 = vmul.f32 %v94_v50, %v344_v9  ;;  %v140_v63 = vand.u32 2147483647, %v213_v38  ;;  %v103_v2 = vmul.f32 %v95_v52, %v346_v10 }
  0x41   :  { %224 = vlog2.f32 %v152_v51  ;;  %v104_v3 = vmul.f32 %v96_v55, %v348_v11  ;;  %v105_v4 = vsub.f32 %v97_v53, %v101_v54  ;;  %v130_v5 = vmul.f32 %v211_v37, %v129_v56 }
  0x42   :  { %v147_v6 = vadd.f32 1.0, %v146_v57  ;;  %vm362_vm0 = vcmp.lt.f32.partialorder %v131_v58, 0.0004427343  ;;  %v139_v12 = vmul.f32 %v213_v38, %v138_v59  ;;  %v149_v13 = vand.u32 2147483647, %v215_v40 }
  0x43   :  { %v156_v9 = vadd.f32 1.0, %v155_v60  ;;  %v106_v15 = vsub.f32 %v98_v61, %v102_v62  ;;  %vm141_vm1 = vcmp.lt.f32.partialorder %v140_v63, 0.0004427343  ;;  %v158_v17 = vand.u32 2147483647, %v217_v43 }
  0x44   :  { %v107_v10 = vsub.f32 %v99_v0, %v103_v2  ;;  %v148_v19 = vmul.f32 %v215_v40, %v147_v6  ;;  %vm150_vm2 = vcmp.lt.f32.partialorder %v149_v13, 0.0004427343  ;;  %v108_v25 = vsub.f32 %v100_v1, %v104_v3 }
  0x45   :  { %v157_v22 = vmul.f32 %v217_v43, %v156_v9  ;;  %vm159_vm3 = vcmp.lt.f32.partialorder %v158_v17, 0.0004427343 }
  0x48   :  { %v219_v7 = vpop.eup %218 }
  0x49   :  { %v221_v14 = vpop.eup %220  ;;  %v127_v16 = vmul.f32 0.6931472, %v219_v7 }
  0x4a   :  { %v136_v18 = vmul.f32 0.6931472, %v221_v14  ;;  %v223_v20 = vpop.eup %222 }
  0x4b   :  { %v133_v11 = vsel %vm362_vm0, %v130_v5, %v127_v16  ;;  %v225_v24 = vpop.eup %224  ;;  %v145_v26 = vmul.f32 0.6931472, %v223_v20 }
  0x4c   :  { %v142_v21 = vsel %vm141_vm1, %v139_v12, %v136_v18  ;;  %v161_v23 = vadd.f32 %v133_v11, %v105_v4  ;;  %v154_v28 = vmul.f32 0.6931472, %v225_v24 }
  0x4d   :  { %v162_v27 = vadd.f32 %v142_v21, %v106_v15  ;;  %v151_v29 = vsel %vm150_vm2, %v148_v19, %v145_v26 }
  0x4e   :  { %v160_v31 = vsel %vm159_vm3, %v157_v22, %v154_v28  ;;  %v163_v32 = vadd.f32 %v151_v29, %v107_v10 }
  0x4f   :  { %v166_v30 = vadd.f32 %v162_v27, %v161_v23  ;;  %v164_v33 = vadd.f32 %v160_v31, %v108_v25 }
  0x51   :  { %v167_v34 = vadd.f32 %v166_v30, %v163_v32 }
  0x53   :  { %v168_v35 = vadd.f32 %v167_v34, %v164_v33 }
  0x55   :  { %v175_v36 = vmul.f32 0.00024414063, %v168_v35 }
  0x57   :  { %176 = vst [vmem:[#allocation8] sm:$0xff] %v175_v36 }
  0x58   :  { %281 = shalt.err (!%p278_p6)
}
  0x59   :  { %s282_s10 = scalar_lea.hbm %s382_s2, 128 }
  0x5a   :  { %p283_p7 = scmp.ne.s32.totalorder %s382_s2, %s282_s10  ;;  %p286_p8 = scmp.lt.u32.totalorder %s282_s10, %s382_s2 }
  0x5c   :  { %p288_p9 = pnand %p286_p8, %p283_p7 }
  0x5e   :  { %291 = shalt.err (!%p288_p9)
}
  0x5f   :  { %186 = dma.vmem_to_hbm [thread:$0]  %s184_s6, 128, %s382_s2, [#allocation5]  }
  0x60   :  { %296 = dma.done.wait [#allocation5], 128  }
  0x61   :  { %297 = vsyncadd [#allocation5], 4294967168 }
  0x62   :  { %190 = vsyncpa [#allocation4], 1 }
  0x63   :  { %191 = vsyncpa [#allocation7], 1 }
  0x64   :  { %192 = vsyncpa [#allocation5], 1 }

</bundles_post_ra>
